<compile_context>
chip_gen: v6e
topology: v6e:2x2x1
jax: 0.10.0
libtpu: 0.0.40
codegen_flags: <defaults>
</compile_context>

<pallas_src>
import functools

import jax
import jax.numpy as jnp
from jax import lax
from jax.experimental import pallas as pl
from jax.experimental.pallas import tpu as pltpu

GAMMA = 1.5
ALPHA = 0.25
LANES = 128
MAX_ROW_TILE = 4096     # rows per grid step (f32: 2 MiB per input tile)
CHUNK_ROWS = 512        # rows per in-kernel sub-chunk (bounds live ranges)
APPROX_SIGMOID = False  # pl.reciprocal(approx=True): ~10-20% on v7x, ~2^-12 rel err


def _round_up(x, m):
    return ((x + m - 1) // m) * m


def _cdiv(a, b):
    return -(-a // b)


def _qfocal_kernel(pred_ref, true_ref, out_ref, *, gamma, alpha,
                   rows_full, lane_tail, row_tile, chunk, needs_mask):
    """One grid step: (8,128) partial sum of the quality-focal loss over a row tile."""
    i = pl.program_id(0)
    n_chunks = row_tile // chunk

    def loss_chunk(x, t):
        # Numerically stable BCE-with-logits (reduction='none'):
        #   max(x, 0) - x*t + log1p(exp(-|x|))
        e = jnp.exp(-jnp.abs(x))                      # exp(-|x|), reused below
        bce = jnp.maximum(x, 0.0) - x * t + jnp.log1p(e)
        # sigmoid(x) reusing e:  x >= 0 -> 1/(1+e),  x < 0 -> e/(1+e)
        num = jnp.where(x >= 0.0, 1.0, e)
        if APPROX_SIGMOID:
            pred_prob = num * pl.reciprocal(1.0 + e, approx=True)
        else:
            pred_prob = num / (1.0 + e)
        alpha_factor = t * alpha + (1.0 - t) * (1.0 - alpha)
        d = jnp.abs(t - pred_prob)
        if gamma == 1.5:
            mf = d * jnp.sqrt(d)                      # d**1.5 without log/exp pow
        elif gamma == 2.0:
            mf = d * d
        elif gamma == 1.0:
            mf = d
        else:
            mf = d ** gamma
        return bce * alpha_factor * mf

    def chunk_partial(r0, masked):
        x = pred_ref[pl.ds(r0, chunk), :].astype(jnp.float32)
        t = true_ref[pl.ds(r0, chunk), :].astype(jnp.float32)
        loss = loss_chunk(x, t)
        if masked:
            # Index-based select: boundary-block garbage (even NaN/Inf) in the
            # tail never reaches the sum.  Row-based compare -> no int32
            # overflow for huge tensors.
            grow = i * row_tile + r0 + lax.broadcasted_iota(
                jnp.int32, (chunk, LANES), 0)
            valid = grow < rows_full
            if lane_tail:
                lane = lax.broadcasted_iota(jnp.int32, (chunk, LANES), 1)
                valid = valid | ((grow == rows_full) & (lane < lane_tail))
            loss = jnp.where(valid, loss, 0.0)
        # Per-chunk partial sum: plain VPU adds down to an (8, 128) vreg block.
        return loss.reshape(chunk // 8, 8, LANES).sum(axis=0)

    def accumulate(masked):
        if n_chunks == 1:
            return chunk_partial(0, masked)
        return lax.fori_loop(
            0, n_chunks,
            lambda c, acc: acc + chunk_partial(
                pl.multiple_of(c * chunk, chunk), masked),
            jnp.zeros((8, LANES), jnp.float32),
            unroll=True)

    if not needs_mask:
        out_ref[0] = accumulate(False)
    else:
        last = pl.num_programs(0) - 1

        @pl.when(i < last)
        def _():
            out_ref[0] = accumulate(False)

        @pl.when(i == last)
        def _():
            out_ref[0] = accumulate(True)


def qfocal_loss(pred, true, gamma=GAMMA, alpha=ALPHA, reduction="mean"):
    """Quality focal loss (matches QFocalLoss wrapping nn.BCEWithLogitsLoss)."""
    assert pred.shape == true.shape
    n_elem = pred.size

    rows_full, lane_tail = divmod(n_elem, LANES)
    rows = rows_full + (1 if lane_tail else 0)

    pred_flat = pred.reshape(-1)
    true_flat = true.reshape(-1)
    if lane_tail:
        # Tiny (<128 elem) pad only to make the (rows, 128) reshape legal; the
        # padded lanes are masked out in the last grid step.
        pad = LANES - lane_tail
        pred_flat = jnp.pad(pred_flat, (0, pad))
        true_flat = jnp.pad(true_flat, (0, pad))
    pred2d = pred_flat.reshape(rows, LANES)
    true2d = true_flat.reshape(rows, LANES)

    # Balanced row tile: as close to MAX_ROW_TILE as possible, split mid-size
    # inputs into >= 2 blocks so both v7x TensorCores get work.
    num_blocks = _cdiv(rows, MAX_ROW_TILE)
    if num_blocks == 1 and rows >= 2048:
        num_blocks = 2
    row_tile = _cdiv(rows, num_blocks)
    if row_tile > CHUNK_ROWS:
        row_tile = _round_up(row_tile, CHUNK_ROWS)
        chunk = CHUNK_ROWS
    else:
        row_tile = _round_up(max(row_tile, 8), 8)
        chunk = row_tile
    num_blocks = _cdiv(rows, row_tile)

    needs_mask = bool(lane_tail) or (rows % row_tile != 0)
    in_bytes = pred.dtype.itemsize + true.dtype.itemsize

    kernel = functools.partial(
        _qfocal_kernel, gamma=gamma, alpha=alpha, rows_full=rows_full,
        lane_tail=lane_tail, row_tile=row_tile, chunk=chunk,
        needs_mask=needs_mask)

    partials = pl.pallas_call(
        kernel,
        out_shape=jax.ShapeDtypeStruct((num_blocks, 8, LANES), jnp.float32),
        grid_spec=pltpu.PrefetchScalarGridSpec(
            num_scalar_prefetch=0,
            grid=(num_blocks,),
            in_specs=[
                pl.BlockSpec((row_tile, LANES), lambda i: (i, 0)),
                pl.BlockSpec((row_tile, LANES), lambda i: (i, 0)),
            ],
            out_specs=pl.BlockSpec((1, 8, LANES), lambda i: (i, 0, 0)),
        ),
        compiler_params=pltpu.CompilerParams(
            dimension_semantics=("parallel",),
            # Covers 2 inputs x 2 buffers x (4096,128) f32 tiles with headroom;
            # within physical VMEM on v5e/v6e (128 MiB) and v7x (64 MiB).
            vmem_limit_bytes=32 * 1024 * 1024,
        ),
        cost_estimate=pl.CostEstimate(
            flops=12 * rows * LANES,
            transcendentals=4 * rows * LANES,
            bytes_accessed=in_bytes * rows * LANES + num_blocks * 8 * LANES * 4,
        ),
    )(pred2d, true2d)

    loss_sum = jnp.sum(partials)
    if reduction == "mean":
        return loss_sum / jnp.float32(n_elem)
    elif reduction == "sum":
        return loss_sum
    else:
        # TODO(synk): 'none' reduction (full elementwise map output) is not
        # wired through this reduced-partial kernel path.
        raise NotImplementedError("only 'mean'/'sum' reductions supported")


def _reference(pred, true, gamma=GAMMA, alpha=ALPHA):
    x = pred.astype(jnp.float32)
    t = true.astype(jnp.float32)
    bce = jnp.maximum(x, 0.0) - x * t + jnp.log1p(jnp.exp(-jnp.abs(x)))
    p = jax.nn.sigmoid(x)
    af = t * alpha + (1.0 - t) * (1.0 - alpha)
    mf = jnp.abs(t - p) ** gamma
    return jnp.mean(bce * af * mf)


if __name__ == "__main__":
    key = jax.random.PRNGKey(0)
    k1, k2 = jax.random.split(key)
    # NCHW, matching PyTorch conv-style outputs fed to the loss.
    pred = jax.random.normal(k1, (2, 4, 16, 16), dtype=jnp.float32)
    true = (jax.random.uniform(k2, (2, 4, 16, 16)) > 0.5).astype(jnp.float32)

    out = qfocal_loss(pred, true)
    out = jax.block_until_ready(out)

    ref = _reference(pred, true)
    assert jnp.allclose(out, ref, rtol=1e-5, atol=1e-6), (out, ref)
    print("KERNEL_OK")
</pallas_src>

<mosaic_0001>
module attributes {stable_mosaic.version = 11 : i64} {
  func.func @_qfocal_kernel(%arg0: i32, %arg1: memref<16x128xf32, #tpu.memory_space<vmem>>, %arg2: memref<16x128xf32, #tpu.memory_space<vmem>>, %arg3: memref<1x8x128xf32, #tpu.memory_space<vmem>>) attributes {dimension_semantics = [#tpu.dimension_semantics<parallel>], iteration_bounds = array<i64: 1>, scalar_prefetch = 0 : i64, scratch_operands = 0 : i64, tpu.core_type = #tpu.core_type<tc>, window_params = [{transform_indices = @transform_0, window_bounds = array<i64: 16, 128>}, {transform_indices = @transform_1, window_bounds = array<i64: 16, 128>}, {transform_indices = @transform_2, window_bounds = array<i64: 1, 8, 128>}]} {
    %c0 = arith.constant 0 : index
    %c0_0 = arith.constant 0 : index
    %0 = vector.load %arg1[%c0, %c0_0] : memref<16x128xf32, #tpu.memory_space<vmem>>, vector<16x128xf32>
    %c0_1 = arith.constant 0 : index
    %c0_2 = arith.constant 0 : index
    %1 = vector.load %arg2[%c0_1, %c0_2] : memref<16x128xf32, #tpu.memory_space<vmem>>, vector<16x128xf32>
    %2 = math.absf %0 : vector<16x128xf32>
    %cst = arith.constant 0.000000e+00 : f32
    %3 = vector.broadcast %cst : f32 to vector<16x128xf32>
    %4 = arith.subf %3, %2 : vector<16x128xf32>
    %5 = math.exp %4 : vector<16x128xf32>
    %cst_3 = arith.constant 0.000000e+00 : f32
    %6 = vector.broadcast %cst_3 : f32 to vector<16x128xf32>
    %7 = arith.maximumf %0, %6 : vector<16x128xf32>
    %8 = arith.mulf %0, %1 : vector<16x128xf32>
    %9 = arith.subf %7, %8 : vector<16x128xf32>
    %10 = math.log1p %5 : vector<16x128xf32>
    %11 = arith.addf %9, %10 : vector<16x128xf32>
    %cst_4 = arith.constant 0.000000e+00 : f32
    %12 = vector.broadcast %cst_4 : f32 to vector<16x128xf32>
    %13 = arith.cmpf oge, %0, %12 : vector<16x128xf32>
    %cst_5 = arith.constant 1.000000e+00 : f32
    %14 = vector.broadcast %cst_5 : f32 to vector<16x128xf32>
    %15 = arith.select %13, %14, %5 : vector<16x128xi1>, vector<16x128xf32>
    %cst_6 = arith.constant 1.000000e+00 : f32
    %16 = vector.broadcast %cst_6 : f32 to vector<16x128xf32>
    %17 = arith.addf %16, %5 : vector<16x128xf32>
    %18 = arith.divf %15, %17 : vector<16x128xf32>
    %cst_7 = arith.constant 2.500000e-01 : f32
    %19 = vector.broadcast %cst_7 : f32 to vector<16x128xf32>
    %20 = arith.mulf %1, %19 : vector<16x128xf32>
    %cst_8 = arith.constant 1.000000e+00 : f32
    %21 = vector.broadcast %cst_8 : f32 to vector<16x128xf32>
    %22 = arith.subf %21, %1 : vector<16x128xf32>
    %cst_9 = arith.constant 7.500000e-01 : f32
    %23 = vector.broadcast %cst_9 : f32 to vector<16x128xf32>
    %24 = arith.mulf %22, %23 : vector<16x128xf32>
    %25 = arith.addf %20, %24 : vector<16x128xf32>
    %26 = arith.subf %1, %18 : vector<16x128xf32>
    %27 = math.absf %26 : vector<16x128xf32>
    %28 = math.sqrt %27 : vector<16x128xf32>
    %29 = arith.mulf %27, %28 : vector<16x128xf32>
    %30 = arith.mulf %11, %25 : vector<16x128xf32>
    %31 = arith.mulf %30, %29 : vector<16x128xf32>
    %32 = vector.shape_cast %31 : vector<16x128xf32> to vector<2x8x128xf32>
    %cst_10 = arith.constant dense<0.000000e+00> : vector<8x128xf32>
    %33 = vector.multi_reduction <add>, %32, %cst_10 [0] : vector<2x8x128xf32> to vector<8x128xf32>
    %c0_11 = arith.constant 0 : index
    %c0_12 = arith.constant 0 : index
    %c0_13 = arith.constant 0 : index
    %34 = vector.load %arg3[%c0_11, %c0_12, %c0_13] : memref<1x8x128xf32, #tpu.memory_space<vmem>>, vector<1x8x128xf32>
    %35 = vector.shape_cast %34 : vector<1x8x128xf32> to vector<8x128xf32>
    %36 = vector.shape_cast %33 : vector<8x128xf32> to vector<1x8x128xf32>
    tpu.vector_store %arg3[%c0_11, %c0_12, %c0_13], %36 {strides = array<i32>} : memref<1x8x128xf32, #tpu.memory_space<vmem>>, vector<1x8x128xf32>,
    return
  }
  func.func @transform_0(%arg0: i32) -> (i32, i32) {
    %c0_i32 = arith.constant 0 : i32
    %c0_i32_0 = arith.constant 0 : i32
    return %arg0, %c0_i32 : i32, i32
  }
  func.func @transform_1(%arg0: i32) -> (i32, i32) {
    %c0_i32 = arith.constant 0 : i32
    %c0_i32_0 = arith.constant 0 : i32
    return %arg0, %c0_i32 : i32, i32
  }
  func.func @transform_2(%arg0: i32) -> (i32, i32, i32) {
    %c0_i32 = arith.constant 0 : i32
    %c0_i32_0 = arith.constant 0 : i32
    %c0_i32_1 = arith.constant 0 : i32
    return %arg0, %c0_i32, %c0_i32_0 : i32, i32, i32
  }
}

</mosaic_0001>

<bundles_post_ra>
// kernel: tpu_custom_call.1
= control target key start
LH: loop header
LB: loop body
LE: loop exit
PB: predicated region body
PF: predicated region fallthrough
CT: control target
= control target key end

     0   :  { %7 = vsyncpa [#allocation3], 0  ;;  %s254_s0 = inlined_call_operand.hbm [shape: f32[16,128], index: 0, kind: input, shape index: {}]   ;;  %s255_s1 = inlined_call_operand.hbm [shape: f32[16,128], index: 1, kind: input, shape index: {}]   ;;  %s256_s2 = inlined_call_operand.hbm [shape: f32[1,8,128], index: 2, kind: output, shape index: {}]  }
   0x1   :  { %8 = vsyncpa [#allocation6], 0 }
   0x2   :  { %9 = vsyncpa [#allocation4], 0  ;;  %s225_s9 = smov [#allocation2]  }
   0x3   :  { %s15_s10 = sshll.u32 %s225_s9, 4  ;;  %s16_s10 = int_to_ptr.vmem [resolvable:$true] %s15_s10 }
   0x4   :  { %s167_s11 = scalar_lea.vmem %s16_s10, 256  ;;  %p172_p1 = scmp.lt.s32.totalorder %s16_s10, %s16_s10 }
   0x5   :  { %p168_p0 = scmp.ne.s32.totalorder %s16_s10, %s167_s11  ;;  %p173_p2 = scmp.lt.s32.totalorder %s167_s11, %s167_s11 }
   0x7   :  { %p174_p3 = por %p173_p2, %p172_p1 }
   0x9   :  { %p175_p4 = pnand %p174_p3, %p168_p0 }
   0xb   :  { %178 = shalt.err (!%p175_p4)
}
   0xc   :  { %s226_s12 = smov 128   ;;  %s227_s13 = smov 8  }
   0xd   :  { %21 = dma.hbm_to_vmem [thread:$0]  %s254_s0, 256, %s16_s10, [#allocation3], %s226_s12, %s226_s12, %s227_s13  }
   0xe   :  { %s228_s16 = smov [#allocation5]  }
   0xf   :  { %s27_s17 = sshll.u32 %s228_s16, 4  ;;  %s28_s17 = int_to_ptr.vmem [resolvable:$true] %s27_s17 }
  0x10   :  { %s187_s18 = scalar_lea.vmem %s28_s17, 256  ;;  %p192_p6 = scmp.lt.s32.totalorder %s28_s17, %s28_s17 }
  0x11   :  { %p188_p5 = scmp.ne.s32.totalorder %s28_s17, %s187_s18  ;;  %p193_p7 = scmp.lt.s32.totalorder %s187_s18, %s187_s18 }
  0x13   :  { %p194_p8 = por %p193_p7, %p192_p6 }
  0x15   :  { %p195_p9 = pnand %p194_p8, %p188_p5 }
  0x17   :  { %198 = shalt.err (!%p195_p9)
}
  0x18   :  { %33 = dma.hbm_to_vmem [thread:$0]  %s255_s1, 256, %s28_s17, [#allocation6], %s226_s12, %s226_s12, %s227_s13  }
  0x19   :  { %219 = dma.done.wait [#allocation3], 256  }
  0x1a   :  { %220 = vsyncadd [#allocation3], 4294967040 }
  0x1b   :  { %221 = dma.done.wait [#allocation6], 256  }
  0x1c   :  { %222 = vsyncadd [#allocation6], 4294967040  ;;  %v40_v0 = vld [vmem:[#allocation2] sm:$0xff]  ;;  %v41_v1 = vld [vmem:[#allocation2 + $0x8] sm:$0xff]  ;;  %s229_s0 = smov [#allocation7]  }
  0x1d   :  { %v44_v2 = vand.u32 2147483647, %v40_v0  ;;  %v45_v3 = vand.u32 2147483647, %v41_v1  ;;  %vm78_vm0 = vcmp.ge.f32.partialorder %v40_v0, 0.0  ;;  %vm79_vm1 = vcmp.ge.f32.partialorder %v41_v1, 0.0 }
  0x1e   :  { %v42_v15 = vld [vmem:[#allocation5] sm:$0xff]  ;;  %v43_v17 = vld [vmem:[#allocation5 + $0x8] sm:$0xff]  ;;  %v52_v32 = vmax.f32 %v40_v0, 0.0  ;;  %v53_v33 = vmax.f32 %v41_v1, 0.0  ;;  %s128_s1 = sshll.u32 %s229_s0, 4  ;;  %s129_s1 = int_to_ptr.vmem [resolvable:$true] %s128_s1 }
  0x1f   :  { %v46_v4 = vsub.f32 0.0, %v44_v2  ;;  %v47_v5 = vsub.f32 0.0, %v45_v3  ;;  %v54_v34 = vmul.f32 %v42_v15, %v40_v0  ;;  %v90_v35 = vsub.f32 1.0, %v42_v15  ;;  %s199_s21 = scalar_lea.vmem %s129_s1, 128  ;;  %p204_p11 = scmp.lt.s32.totalorder %s129_s1, %s129_s1 }
  0x20   :  { %v55_v36 = vmul.f32 %v43_v17, %v41_v1  ;;  %v91_v39 = vsub.f32 1.0, %v43_v17  ;;  %v88_v43 = vmul.f32 0.25, %v42_v15  ;;  %v89_v47 = vmul.f32 0.25, %v43_v17  ;;  %p200_p10 = scmp.ne.s32.totalorder %s129_s1, %s199_s21  ;;  %p205_p12 = scmp.lt.s32.totalorder %s199_s21, %s199_s21 }
  0x21   :  { %v48_v6 = vmul.f32 1.442695, %v46_v4  ;;  %v50_v7 = vmul.f32 1.442695, %v47_v5  ;;  %v56_v42 = vsub.f32 %v52_v32, %v54_v34  ;;  %v92_v44 = vmul.f32 0.75, %v90_v35 }
  0x22   :  { %v57_v45 = vsub.f32 %v53_v33, %v55_v36  ;;  %v93_v48 = vmul.f32 0.75, %v91_v39  ;;  %p206_p13 = por %p205_p12, %p204_p11 }
  0x23   :  { %143 = vpow2.f32 %v48_v6  ;;  %v94_v51 = vadd.f32 %v92_v44, %v88_v43 }
  0x24   :  { %145 = vpow2.f32 %v50_v7  ;;  %v95_v54 = vadd.f32 %v93_v48, %v89_v47  ;;  %p207_p0 = pnand %p206_p13, %p200_p10 }
  0x30   :  { %v144_v8 = vpop.eup %143 }
  0x31   :  { %v146_v9 = vpop.eup %145  ;;  %v58_v10 = vadd.f32 1.0, %v144_v8  ;;  %v80_v12 = vsel %vm78_vm0, 1.0, %v144_v8  ;;  %v61_v21 = vmul.f32 -0.5, %v144_v8  ;;  %v64_v28 = vand.u32 2147483647, %v144_v8 }
  0x32   :  { %v67_v11 = vadd.f32 1.0, %v146_v9  ;;  %v81_v13 = vsel %vm79_vm1, 1.0, %v146_v9  ;;  %v70_v23 = vmul.f32 -0.5, %v146_v9  ;;  %v73_v31 = vand.u32 2147483647, %v146_v9 }
  0x33   :  { %147 = vrcp.f32 %v58_v10  ;;  %v62_v26 = vadd.f32 1.0, %v61_v21  ;;  %vm65_vm2 = vcmp.lt.f32.partialorder %v64_v28, 0.0004427343 }
  0x34   :  { %149 = vrcp.f32 %v67_v11  ;;  %v71_v29 = vadd.f32 1.0, %v70_v23  ;;  %vm74_vm3 = vcmp.lt.f32.partialorder %v73_v31, 0.0004427343 }
  0x35   :  { %151 = vlog2.f32 %v58_v10  ;;  %v63_v38 = vmul.f32 %v144_v8, %v62_v26 }
  0x36   :  { %153 = vlog2.f32 %v67_v11  ;;  %v72_v41 = vmul.f32 %v146_v9, %v71_v29 }
  0x40   :  { %v148_v14 = vpop.eup %147 }
  0x41   :  { %v150_v16 = vpop.eup %149  ;;  %v85_v18 = vmul.f32 %v148_v14, %v80_v12 }
  0x42   :  { %v87_v19 = vmul.f32 %v150_v16, %v81_v13  ;;  %v152_v27 = vpop.eup %151 }
  0x43   :  { %v96_v20 = vsub.f32 %v42_v15, %v85_v18  ;;  %v154_v30 = vpop.eup %153  ;;  %v60_v37 = vmul.f32 0.6931472, %v152_v27 }
  0x44   :  { %v97_v22 = vsub.f32 %v43_v17, %v87_v19  ;;  %v69_v40 = vmul.f32 0.6931472, %v154_v30 }
  0x45   :  { %v98_v24 = vand.u32 2147483647, %v96_v20  ;;  %v66_v46 = vsel %vm65_vm2, %v63_v38, %v60_v37 }
  0x46   :  { %v99_v25 = vand.u32 2147483647, %v97_v22  ;;  %v75_v49 = vsel %vm74_vm3, %v72_v41, %v69_v40  ;;  %v76_v50 = vadd.f32 %v66_v46, %v56_v42 }
  0x47   :  { %155 = vrsqrt.f32 %v98_v24  ;;  %v77_v53 = vadd.f32 %v75_v49, %v57_v45  ;;  %vm102_vm4 = vcmp.eq.f32.partialorder %v98_v24, inf  ;;  %v105_v55 = vand.u32 2147483648, %v98_v24 }
  0x48   :  { %157 = vrsqrt.f32 %v99_v25  ;;  %vm104_vm5 = vcmp.eq.f32.partialorder %v98_v24, 0.0  ;;  %vm109_vm6 = vcmp.eq.f32.partialorder %v99_v25, inf  ;;  %v112_v58 = vand.u32 2147483648, %v99_v25 }
  0x49   :  { %vm111_vm7 = vcmp.eq.f32.partialorder %v99_v25, 0.0  ;;  %v116_v61 = vmul.f32 %v94_v51, %v76_v50  ;;  %v117_v0 = vmul.f32 %v95_v54, %v77_v53 }
  0x54   :  { %v156_v52 = vpop.eup %155 }
  0x55   :  { %v158_v56 = vpop.eup %157  ;;  %v101_v57 = vmul.f32 %v156_v52, %v98_v24 }
  0x56   :  { %v108_v59 = vmul.f32 %v158_v56, %v99_v25 }
  0x57   :  { %v103_v60 = vsel %vm102_vm4, %v98_v24, %v101_v57 }
  0x58   :  { %v106_v62 = vsel %vm104_vm5, %v105_v55, %v103_v60  ;;  %v110_v63 = vsel %vm109_vm6, %v99_v25, %v108_v59 }
  0x59   :  { %v113_v1 = vsel %vm111_vm7, %v112_v58, %v110_v63  ;;  %v114_v2 = vmul.f32 %v106_v62, %v98_v24 }
  0x5a   :  { %v115_v3 = vmul.f32 %v113_v1, %v99_v25 }
  0x5b   :  { %v118_v4 = vmul.f32 %v116_v61, %v114_v2 }
  0x5c   :  { %v119_v5 = vmul.f32 %v117_v0, %v115_v3 }
  0x5e   :  { %v120_v6 = vadd.f32 %v119_v5, %v118_v4 }
  0x60   :  { %121 = vst [vmem:[#allocation7] sm:$0xff] %v120_v6 }
  0x61   :  { %210 = shalt.err (!%p207_p0)
}
  0x62   :  { %131 = dma.vmem_to_hbm [thread:$0]  %s129_s1, 128, %s256_s2, [#allocation4]  }
  0x63   :  { %223 = dma.done.wait [#allocation4], 128  }
  0x64   :  { %224 = vsyncadd [#allocation4], 4294967168 }
  0x65   :  { %135 = vsyncpa [#allocation3], 1 }
  0x66   :  { %136 = vsyncpa [#allocation6], 1 }
  0x67   :  { %137 = vsyncpa [#allocation4], 1 }

</bundles_post_ra>
